<compile_context>
chip_gen: v5e
topology: v5e:2x2
jax: 0.10.0
libtpu: 0.0.40
codegen_flags: <defaults>
</compile_context>

<pallas_src>
import jax
import jax.numpy as jnp
from jax.experimental import pallas as pl
from jax.experimental.pallas import tpu as pltpu

NUM_CLASSES = 27
IN_FEATURES = 28 * 28  # 784


def _round_up(n, m):
    return ((n + m - 1) // m) * m


def _device_tb_max():
    """Chip-aware default batch tile (rows)."""
    try:
        kind = jax.devices()[0].device_kind.lower()
    except Exception:
        return 1024
    if "7" in kind:
        # v7x: HBM ~3.2 TB/s -> bigger tiles amortize per-step overhead;
        # 2048 rows double-buffered (~13.5 MiB) is well under its 64 MiB VMEM.
        return 2048
    # v5e (16 MiB default scoped VMEM) / v6e (plateau at 512-1024) / unknown.
    return 1024


def _pick_tb(b, tb_max):
    """Effective batch tile: legal block shape + >=2 grid steps when worthwhile."""
    if b <= 8:
        return b  # full-extent block (block dim == array dim is always legal)
    if b <= tb_max:
        if b >= 128:
            # Split so the "parallel" grid has >=2 steps -> both v7x TCs busy.
            return min(tb_max, _round_up(-(-b // 2), 8))
        return b  # single full-extent tile for small batches
    return tb_max


def linear_logsoftmax_kernel(x_ref, w_ref, b_ref, o_ref):
    # x_ref: (TB, 784)  w_ref: (784, 27)  b_ref: (1, 27)  o_ref: (TB, 27)
    logits = (
        jnp.dot(x_ref[...], w_ref[...], preferred_element_type=jnp.float32)
        + b_ref[...]
    )
    # Numerically stable log_softmax over classes (last axis).  max/sum use the
    # XLU slot, exp/log the EUP slot -- both free relative to the saturated
    # x load/DMA path.  Rows are independent, so garbage rows in a padded
    # boundary tile are harmless (their writeback is masked by Pallas).
    m = jnp.max(logits, axis=-1, keepdims=True)
    shifted = logits - m
    lse = jnp.log(jnp.sum(jnp.exp(shifted), axis=-1, keepdims=True))
    o_ref[...] = (shifted - lse).astype(o_ref.dtype)


def linear_reg_forward(x, w_t, bias, *, tb=None):
    """x: (b, c, h, w) with c*h*w == 784; w_t: (784, 27); bias: (27,)."""
    b = x.shape[0]
    x_flat = x.reshape(b, -1)  # same row-major order as torch's x.view(b, -1)
    assert x_flat.shape[1] == IN_FEATURES

    tb_max = tb if tb is not None else _device_tb_max()
    tb_eff = _pick_tb(b, tb_max)
    grid = (pl.cdiv(b, tb_eff),)

    # bf16 producer path: keep x untouched (no wrapper HBM round trip), just
    # match the tiny weight so the MXU runs bf16 x bf16 -> f32.
    if x_flat.dtype == jnp.bfloat16 and w_t.dtype != jnp.bfloat16:
        w_t = w_t.astype(jnp.bfloat16)
    bias2d = bias.reshape(1, NUM_CLASSES).astype(jnp.float32)

    # Explicit scoped-VMEM limit from the actual double-buffered footprint,
    # with headroom (floor 16 MiB, cap 48 MiB -- safe on v5e/v6e/v7x).
    buf_bytes = 2 * (
        tb_eff * IN_FEATURES * x_flat.dtype.itemsize      # x tiles
        + tb_eff * NUM_CLASSES * 4                         # out tiles (f32)
        + IN_FEATURES * NUM_CLASSES * w_t.dtype.itemsize   # weight
        + NUM_CLASSES * 4                                   # bias
    )
    vmem_limit = int(min(max(2 * buf_bytes, 16 << 20), 48 << 20))

    out = pl.pallas_call(
        linear_logsoftmax_kernel,
        out_shape=jax.ShapeDtypeStruct((b, NUM_CLASSES), jnp.float32),
        grid=grid,
        in_specs=[
            # Batch-tiled activations: double-buffered across the grid; the
            # partial boundary tile (b % tb_eff != 0) gets padded reads.
            pl.BlockSpec((tb_eff, IN_FEATURES), lambda i: (i, 0)),
            # Weight + bias: same block every step -> resident in VMEM.
            pl.BlockSpec((IN_FEATURES, NUM_CLASSES), lambda i: (0, 0)),
            pl.BlockSpec((1, NUM_CLASSES), lambda i: (0, 0)),
        ],
        # Boundary output block is masked on writeback -> no out[:b] slice.
        out_specs=pl.BlockSpec((tb_eff, NUM_CLASSES), lambda i: (i, 0)),
        compiler_params=pltpu.CompilerParams(
            # Independent batch tiles: shard the grid across TensorCores.
            dimension_semantics=("parallel",),
            vmem_limit_bytes=vmem_limit,
        ),
    )(x_flat, w_t, bias2d)

    return out


if __name__ == "__main__":
    key = jax.random.PRNGKey(0)
    kx, kw, kb, kx2 = jax.random.split(key, 4)

    # Input consistent with the forward: b=2, c=1, h=w=28 (c*h*w == 784).
    x = jax.random.normal(kx, (2, 1, 28, 28), dtype=jnp.float32)

    # Deterministic parameter init (mimics nn.Linear uniform(-1/sqrt(in), 1/sqrt(in))).
    bound = 1.0 / (IN_FEATURES ** 0.5)
    w = jax.random.uniform(
        kw, (NUM_CLASSES, IN_FEATURES), minval=-bound, maxval=bound,
        dtype=jnp.float32,
    )
    bias = jax.random.uniform(
        kb, (NUM_CLASSES,), minval=-bound, maxval=bound, dtype=jnp.float32
    )
    w_t = w.T  # (784, 27)

    # TODO(synk): nn.Dropout(p=0.5) is identity at inference; training-mode
    # stochastic dropout (masking + 1/(1-p) scaling) is intentionally not modeled.

    # --- main check: small batch, single full-extent tile --------------------
    out = linear_reg_forward(x, w_t, bias)
    out = jax.block_until_ready(out)
    ref = jax.nn.log_softmax(x.reshape(2, -1) @ w_t + bias, axis=-1)
    assert out.shape == (2, NUM_CLASSES)
    assert jnp.allclose(out, ref, atol=1e-5), "mismatch vs JAX reference"
    assert jnp.allclose(jnp.exp(out).sum(axis=1), 1.0, atol=1e-5)

    # --- ragged-batch check: exercises the cdiv grid + masked boundary tile --
    x_rag = jax.random.normal(kx2, (10, 1, 28, 28), dtype=jnp.float32)
    out_rag = jax.block_until_ready(linear_reg_forward(x_rag, w_t, bias, tb=8))
    ref_rag = jax.nn.log_softmax(x_rag.reshape(10, -1) @ w_t + bias, axis=-1)
    assert out_rag.shape == (10, NUM_CLASSES)
    assert jnp.allclose(out_rag, ref_rag, atol=1e-5), "ragged-batch mismatch"

    # --- bf16-producer check: x fed as bf16, f32 MXU accumulation ------------
    x_bf = x.astype(jnp.bfloat16)
    out_bf = jax.block_until_ready(linear_reg_forward(x_bf, w_t, bias))
    ref_bf = jax.nn.log_softmax(
        x_bf.reshape(2, -1).astype(jnp.float32)
        @ w_t.astype(jnp.bfloat16).astype(jnp.float32) + bias, axis=-1)
    assert jnp.allclose(out_bf, ref_bf, atol=1e-3), "bf16-input mismatch"

    print("KERNEL_OK")
</pallas_src>

<mosaic_0001>
module attributes {stable_mosaic.version = 11 : i64} {
  func.func @linear_logsoftmax_kernel(%arg0: i32, %arg1: memref<2x784xf32, #tpu.memory_space<vmem>>, %arg2: memref<784x27xf32, #tpu.memory_space<vmem>>, %arg3: memref<1x27xf32, #tpu.memory_space<vmem>>, %arg4: memref<2x27xf32, #tpu.memory_space<vmem>>) attributes {dimension_semantics = [#tpu.dimension_semantics<parallel>], iteration_bounds = array<i64: 1>, scalar_prefetch = 0 : i64, scratch_operands = 0 : i64, tpu.core_type = #tpu.core_type<tc>, window_params = [{transform_indices = @transform_0, window_bounds = array<i64: 2, 784>}, {pipeline_mode = #tpu.pipeline_mode<synchronous>, transform_indices = @transform_1, window_bounds = array<i64: 784, 27>}, {pipeline_mode = #tpu.pipeline_mode<synchronous>, transform_indices = @transform_2, window_bounds = array<i64: 1, 27>}, {transform_indices = @transform_3, window_bounds = array<i64: 2, 27>}]} {
    %c0 = arith.constant 0 : index
    %c0_0 = arith.constant 0 : index
    %0 = vector.load %arg1[%c0, %c0_0] : memref<2x784xf32, #tpu.memory_space<vmem>>, vector<2x784xf32>
    %c0_1 = arith.constant 0 : index
    %c0_2 = arith.constant 0 : index
    %1 = vector.load %arg2[%c0_1, %c0_2] : memref<784x27xf32, #tpu.memory_space<vmem>>, vector<784x27xf32>
    %cst = arith.constant dense<0.000000e+00> : vector<2x27xf32>
    %2 = tpu.matmul %0, %1, %cst {dimension_numbers = #tpu.dot_dimension_numbers<[1], [0], [0], [1], [0, 0, 1, 1], [], []>} : vector<2x784xf32>, vector<784x27xf32>, vector<2x27xf32> -> vector<2x27xf32>
    %c0_3 = arith.constant 0 : index
    %c0_4 = arith.constant 0 : index
    %3 = vector.load %arg3[%c0_3, %c0_4] : memref<1x27xf32, #tpu.memory_space<vmem>>, vector<1x27xf32>
    %4 = vector.broadcast %3 : vector<1x27xf32> to vector<2x27xf32>
    %5 = arith.addf %2, %4 : vector<2x27xf32>
    %cst_5 = arith.constant dense<0xFF800000> : vector<2xf32>
    %6 = vector.multi_reduction <maximumf>, %5, %cst_5 [1] : vector<2x27xf32> to vector<2xf32>
    %7 = vector.shape_cast %6 : vector<2xf32> to vector<2x1xf32>
    %8 = vector.broadcast %7 : vector<2x1xf32> to vector<2x27xf32>
    %9 = arith.subf %5, %8 : vector<2x27xf32>
    %10 = math.exp %9 : vector<2x27xf32>
    %cst_6 = arith.constant dense<0.000000e+00> : vector<2xf32>
    %11 = vector.multi_reduction <add>, %10, %cst_6 [1] : vector<2x27xf32> to vector<2xf32>
    %12 = vector.shape_cast %11 : vector<2xf32> to vector<2x1xf32>
    %13 = math.log %12 : vector<2x1xf32>
    %14 = vector.broadcast %13 : vector<2x1xf32> to vector<2x27xf32>
    %15 = arith.subf %9, %14 : vector<2x27xf32>
    %c0_7 = arith.constant 0 : index
    %c0_8 = arith.constant 0 : index
    %16 = vector.load %arg4[%c0_7, %c0_8] : memref<2x27xf32, #tpu.memory_space<vmem>>, vector<2x27xf32>
    tpu.vector_store %arg4[%c0_7, %c0_8], %15 {strides = array<i32>} : memref<2x27xf32, #tpu.memory_space<vmem>>, vector<2x27xf32>,
    return
  }
  func.func @transform_0(%arg0: i32) -> (i32, i32) {
    %c0_i32 = arith.constant 0 : i32
    %c0_i32_0 = arith.constant 0 : i32
    return %arg0, %c0_i32 : i32, i32
  }
  func.func @transform_1(%arg0: i32) -> (i32, i32) {
    %c0_i32 = arith.constant 0 : i32
    %c0_i32_0 = arith.constant 0 : i32
    %c0_i32_1 = arith.constant 0 : i32
    return %c0_i32, %c0_i32_0 : i32, i32
  }
  func.func @transform_2(%arg0: i32) -> (i32, i32) {
    %c0_i32 = arith.constant 0 : i32
    %c0_i32_0 = arith.constant 0 : i32
    %c0_i32_1 = arith.constant 0 : i32
    return %c0_i32, %c0_i32_0 : i32, i32
  }
  func.func @transform_3(%arg0: i32) -> (i32, i32) {
    %c0_i32 = arith.constant 0 : i32
    %c0_i32_0 = arith.constant 0 : i32
    return %arg0, %c0_i32 : i32, i32
  }
}

</mosaic_0001>

<bundles_post_ra>
// kernel: tpu_custom_call.1
= control target key start
LH: loop header
LB: loop body
LE: loop exit
PB: predicated region body
PF: predicated region fallthrough
CT: control target
= control target key end

     0   :  { %s673_s0 = inlined_call_operand.vmem [shape: f32[2,784], index: 0, kind: input, shape index: {}]   ;;  %s674_s1 = inlined_call_operand.vmem [shape: f32[784,27], index: 1, kind: input, shape index: {}]   ;;  %s675_s2 = inlined_call_operand.vmem [shape: f32[1,27], index: 2, kind: input, shape index: {}]   ;;  %s676_s3 = inlined_call_operand.hbm [shape: f32[2,27], index: 3, kind: output, shape index: {}]  }
   0x1   :  { %v32_v0 = vld [vmem:[%s674_s1 + $0x78] sm:$0xff]  ;;  %v31_v1 = vld [vmem:[%s674_s1 + $0x70] sm:$0xff]  ;;  %v30_v4 = vld [vmem:[%s674_s1 + $0x68] sm:$0xff] }
   0x2   :  { %v48_v2 = vld [vmem:[%s674_s1 + $0xf8] sm:$0xff]  ;;  %140 = vmatpush.msra.mxu0 %v32_v0  ;;  %v47_v3 = vld [vmem:[%s674_s1 + $0xf0] sm:$0xff]  ;;  %v46_v5 = vld [vmem:[%s674_s1 + $0xe8] sm:$0xff] }
   0x3   :  { %160 = vmatpush.msra.mxu1 %v48_v2  ;;  %v29_v6 = vld [vmem:[%s674_s1 + $0x60] sm:$0xff]  ;;  %v28_v8 = vld [vmem:[%s674_s1 + $0x58] sm:$0xff]  ;;  %v27_v10 = vld [vmem:[%s674_s1 + $0x50] sm:$0xff] }
   0x4   :  { %141 = vmatpush.msra.mxu0 %v31_v1  ;;  %v45_v7 = vld [vmem:[%s674_s1 + $0xe0] sm:$0xff]  ;;  %v44_v9 = vld [vmem:[%s674_s1 + $0xd8] sm:$0xff]  ;;  %v43_v12 = vld [vmem:[%s674_s1 + $0xd0] sm:$0xff] }
   0x5   :  { %161 = vmatpush.msra.mxu1 %v47_v3  ;;  %v64_v11 = vld [vmem:[%s674_s1 + $0x178] sm:$0xff]  ;;  %v63_v13 = vld [vmem:[%s674_s1 + $0x170] sm:$0xff]  ;;  %v62_v15 = vld [vmem:[%s674_s1 + $0x168] sm:$0xff] }
   0x6   :  { %142 = vmatpush.msra.mxu0 %v30_v4  ;;  %180 = vmatpush.msra.mxu2 %v64_v11  ;;  %v80_v14 = vld [vmem:[%s674_s1 + $0x1f8] sm:$0xff]  ;;  %v79_v16 = vld [vmem:[%s674_s1 + $0x1f0] sm:$0xff]  ;;  %v26_v17 = vld [vmem:[%s674_s1 + $0x48] sm:$0xff] }
   0x7   :  { %162 = vmatpush.msra.mxu1 %v46_v5  ;;  %v42_v18 = vld [vmem:[%s674_s1 + $0xc8] sm:$0xff]  ;;  %200 = vmatpush.msra.mxu3 %v80_v14  ;;  %v61_v19 = vld [vmem:[%s674_s1 + $0x160] sm:$0xff]  ;;  %v60_v23 = vld [vmem:[%s674_s1 + $0x158] sm:$0xff] }
   0x8   :  { %143 = vmatpush.msra.mxu0 %v29_v6  ;;  %181 = vmatpush.msra.mxu2 %v63_v13  ;;  %v78_v20 = vld [vmem:[%s674_s1 + $0x1e8] sm:$0xff]  ;;  %v25_v21 = vld [vmem:[%s674_s1 + $0x40] sm:$0xff]  ;;  %v24_v25 = vld [vmem:[%s674_s1 + $0x38] sm:$0xff] }
   0x9   :  { %163 = vmatpush.msra.mxu1 %v45_v7  ;;  %v41_v22 = vld [vmem:[%s674_s1 + $0xc0] sm:$0xff]  ;;  %201 = vmatpush.msra.mxu3 %v79_v16  ;;  %v40_v26 = vld [vmem:[%s674_s1 + $0xb8] sm:$0xff]  ;;  %v59_v27 = vld [vmem:[%s674_s1 + $0x150] sm:$0xff] }
   0xa   :  { %144 = vmatpush.msra.mxu0 %v28_v8  ;;  %182 = vmatpush.msra.mxu2 %v62_v15  ;;  %v77_v24 = vld [vmem:[%s674_s1 + $0x1e0] sm:$0xff]  ;;  %v76_v28 = vld [vmem:[%s674_s1 + $0x1d8] sm:$0xff]  ;;  %v23_v29 = vld [vmem:[%s674_s1 + $0x30] sm:$0xff] }
   0xb   :  { %164 = vmatpush.msra.mxu1 %v44_v9  ;;  %202 = vmatpush.msra.mxu3 %v78_v20  ;;  %v39_v30 = vld [vmem:[%s674_s1 + $0xb0] sm:$0xff]  ;;  %v58_v31 = vld [vmem:[%s674_s1 + $0x148] sm:$0xff]  ;;  %v57_v35 = vld [vmem:[%s674_s1 + $0x140] sm:$0xff] }
   0xc   :  { %145 = vmatpush.msra.mxu0 %v27_v10  ;;  %183 = vmatpush.msra.mxu2 %v61_v19  ;;  %v75_v32 = vld [vmem:[%s674_s1 + $0x1d0] sm:$0xff]  ;;  %v22_v33 = vld [vmem:[%s674_s1 + $0x28] sm:$0xff]  ;;  %v21_v37 = vld [vmem:[%s674_s1 + $0x20] sm:$0xff] }
   0xd   :  { %165 = vmatpush.msra.mxu1 %v43_v12  ;;  %203 = vmatpush.msra.mxu3 %v77_v24  ;;  %v38_v34 = vld [vmem:[%s674_s1 + $0xa8] sm:$0xff]  ;;  %v37_v38 = vld [vmem:[%s674_s1 + $0xa0] sm:$0xff]  ;;  %v56_v39 = vld [vmem:[%s674_s1 + $0x138] sm:$0xff] }
   0xe   :  { %146 = vmatpush.msra.mxu0 %v26_v17  ;;  %184 = vmatpush.msra.mxu2 %v60_v23  ;;  %v74_v36 = vld [vmem:[%s674_s1 + $0x1c8] sm:$0xff]  ;;  %v73_v40 = vld [vmem:[%s674_s1 + $0x1c0] sm:$0xff]  ;;  %v20_v41 = vld [vmem:[%s674_s1 + $0x18] sm:$0xff] }
   0xf   :  { %166 = vmatpush.msra.mxu1 %v42_v18  ;;  %204 = vmatpush.msra.mxu3 %v76_v28  ;;  %v36_v42 = vld [vmem:[%s674_s1 + $0x98] sm:$0xff]  ;;  %v55_v43 = vld [vmem:[%s674_s1 + $0x130] sm:$0xff]  ;;  %v54_v47 = vld [vmem:[%s674_s1 + $0x128] sm:$0xff] }
  0x10   :  { %147 = vmatpush.msra.mxu0 %v25_v21  ;;  %185 = vmatpush.msra.mxu2 %v59_v27  ;;  %v72_v44 = vld [vmem:[%s674_s1 + $0x1b8] sm:$0xff]  ;;  %v19_v45 = vld [vmem:[%s674_s1 + $0x10] sm:$0xff]  ;;  %v18_v49 = vld [vmem:[%s674_s1 + $0x8] sm:$0xff] }
  0x11   :  { %167 = vmatpush.msra.mxu1 %v41_v22  ;;  %205 = vmatpush.msra.mxu3 %v75_v32  ;;  %v35_v46 = vld [vmem:[%s674_s1 + $0x90] sm:$0xff]  ;;  %v34_v50 = vld [vmem:[%s674_s1 + $0x88] sm:$0xff]  ;;  %v53_v51 = vld [vmem:[%s674_s1 + $0x120] sm:$0xff] }
  0x12   :  { %148 = vmatpush.msra.mxu0 %v24_v25  ;;  %186 = vmatpush.msra.mxu2 %v58_v31  ;;  %v71_v48 = vld [vmem:[%s674_s1 + $0x1b0] sm:$0xff]  ;;  %v70_v52 = vld [vmem:[%s674_s1 + $0x1a8] sm:$0xff]  ;;  %v17_v53 = vld [vmem:[%s674_s1] sm:$0xff] }
  0x13   :  { %168 = vmatpush.msra.mxu1 %v40_v26  ;;  %206 = vmatpush.msra.mxu3 %v74_v36  ;;  %v33_v54 = vld [vmem:[%s674_s1 + $0x80] sm:$0xff]  ;;  %v96_v56 = vld [vmem:[%s674_s1 + $0x278] sm:$0xff]  ;;  %v95_v60 = vld [vmem:[%s674_s1 + $0x270] sm:$0xff] }
  0x14   :  { %149 = vmatpush.msra.mxu0 %v23_v29  ;;  %187 = vmatpush.msra.mxu2 %v57_v35  ;;  %v15_v55 = vld [vmem:[%s673_s0] sm:$0xff]  ;;  %v112_v57 = vld [vmem:[%s674_s1 + $0x2f8] sm:$0xff]  ;;  %v111_v61 = vld [vmem:[%s674_s1 + $0x2f0] sm:$0xff] }
  0x15   :  { %169 = vmatpush.msra.mxu1 %v39_v30  ;;  %207 = vmatpush.msra.mxu3 %v73_v40  ;;  %121 = vst [vmem:[#allocation1] ss:$4 sm:$0xff] %v15_v55  ;;  %v52_v58 = vld [vmem:[%s674_s1 + $0x118] sm:$0xff]  ;;  %v69_v59 = vld [vmem:[%s674_s1 + $0x1a0] sm:$0xff]  ;;  %v51_v62 = vld [vmem:[%s674_s1 + $0x110] sm:$0xff] }
  0x16   :  { %150 = vmatpush.msra.mxu0 %v22_v33  ;;  %188 = vmatpush.msra.mxu2 %v56_v39  ;;  %v68_v63 = vld [vmem:[%s674_s1 + $0x198] sm:$0xff]  ;;  %v16_v0 = vld [vmem:[%s673_s0 + $0x8] sm:$0x3f]  ;;  %v67_v4 = vld [vmem:[%s674_s1 + $0x190] sm:$0xff] }
  0x17   :  { %170 = vmatpush.msra.mxu1 %v38_v34  ;;  %208 = vmatpush.msra.mxu3 %v72_v44  ;;  %v94_v1 = vld [vmem:[%s674_s1 + $0x268] sm:$0xff]  ;;  %123 = vst [vmem:[#allocation1 + $0x20] ss:$4 sm:$0xff] %v16_v0 }
  0x18   :  { %151 = vmatpush.msra.mxu0 %v21_v37  ;;  %189 = vmatpush.msra.mxu2 %v55_v43  ;;  %v110_v2 = vld [vmem:[%s674_s1 + $0x2e8] sm:$0xff] }
  0x19   :  { %171 = vmatpush.msra.mxu1 %v37_v38  ;;  %209 = vmatpush.msra.mxu3 %v71_v48  ;;  %v50_v3 = vld [vmem:[%s674_s1 + $0x108] sm:$0xff] }
  0x1a   :  { %152 = vmatpush.msra.mxu0 %v20_v41  ;;  %190 = vmatpush.msra.mxu2 %v54_v47 }
  0x1b   :  { %172 = vmatpush.msra.mxu1 %v36_v42  ;;  %210 = vmatpush.msra.mxu3 %v70_v52 }
  0x1c   :  { %153 = vmatpush.msra.mxu0 %v19_v45  ;;  %191 = vmatpush.msra.mxu2 %v53_v51 }
  0x1d   :  { %173 = vmatpush.msra.mxu1 %v35_v46  ;;  %211 = vmatpush.msra.mxu3 %v69_v59 }
  0x1e   :  { %154 = vmatpush.msra.mxu0 %v18_v49  ;;  %192 = vmatpush.msra.mxu2 %v52_v58 }
  0x1f   :  { %174 = vmatpush.msra.mxu1 %v34_v50 }
  0x20   :  { %155 = vmatpush.msra.mxu0 %v17_v53 }
  0x21   :  { %175 = vmatpush.msra.mxu1 %v33_v54 }
  0x22   :  { %220 = vmatpush.msrb.mxu0 %v96_v56 }
  0x23   :  { %240 = vmatpush.msrb.mxu1 %v112_v57 }
  0x24   :  { %221 = vmatpush.msrb.mxu0 %v95_v60 }
  0x25   :  { %241 = vmatpush.msrb.mxu1 %v111_v61 }
  0x26   :  { %8 = vsyncpa [#allocation3], 0  ;;  %v93_v5 = vld [vmem:[%s674_s1 + $0x260] sm:$0xff]  ;;  %193 = vmatpush.msra.mxu2 %v51_v62  ;;  %212 = vmatpush.msra.mxu3 %v68_v63  ;;  %v66_v8 = vld [vmem:[%s674_s1 + $0x188] sm:$0xff]  ;;  %vm137_vm0 = vcmask 130048   ;;  %vm280_vm1 = vcmask 214016  }
  0x27   :  { %v109_v6 = vld [vmem:[%s674_s1 + $0x2e0] sm:$0xff]  ;;  %222 = vmatpush.msrb.mxu0 %v94_v1  ;;  %242 = vmatpush.msrb.mxu1 %v110_v2  ;;  %v92_v9 = vld [vmem:[%s674_s1 + $0x258] sm:$0xff]  ;;  %v126_v11 = vld.sshfl [vmem:[#allocation1 + $0x10] sm:$0xff pattern:$0x73625140]  ;;  %s301_s24 = sshll.u32 %s676_s3, 4  ;;  %s302_s24 = int_to_ptr.hbm [resolvable:$true] %s301_s24 }
  0x28   :  { %v49_v7 = vld [vmem:[%s674_s1 + $0x100] sm:$0xff]  ;;  %v108_v10 = vld [vmem:[%s674_s1 + $0x2d8] sm:$0xff]  ;;  %194 = vmatpush.msra.mxu2 %v50_v3  ;;  %213 = vmatpush.msra.mxu3 %v67_v4  ;;  %v91_v13 = vld [vmem:[%s674_s1 + $0x250] sm:$0xff] }
  0x29   :  { %223 = vmatpush.msrb.mxu0 %v93_v5  ;;  %243 = vmatpush.msrb.mxu1 %v109_v6  ;;  %v65_v12 = vld [vmem:[%s674_s1 + $0x180] sm:$0xff]  ;;  %v107_v14 = vld [vmem:[%s674_s1 + $0x2d0] sm:$0xff]  ;;  %v114_v15 = vld [vmem:[%s674_s1 + $0x308] sm:$0xff] }
  0x2a   :  { %195 = vmatpush.msra.mxu2 %v49_v7  ;;  %214 = vmatpush.msra.mxu3 %v66_v8  ;;  %v124_v16 = vld.sshfl [vmem:[#allocation1] sm:$0xff pattern:$0x73625140]  ;;  %v90_v17 = vld [vmem:[%s674_s1 + $0x248] sm:$0xff]  ;;  %v88_v24 = vld [vmem:[%s674_s1 + $0x238] sm:$0xff] }
  0x2b   :  { %224 = vmatpush.msrb.mxu0 %v92_v9  ;;  %244 = vmatpush.msrb.mxu1 %v108_v10  ;;  %v106_v18 = vld [vmem:[%s674_s1 + $0x2c8] sm:$0xff]  ;;  %v127_v19 = vld.sshfl [vmem:[#allocation1 + $0x18] sm:$0xff pattern:$0x73625140]  ;;  %v89_v21 = vld [vmem:[%s674_s1 + $0x240] sm:$0xff] }
  0x2c   :  { %196 = vmatmul.f32.vlgmr.msra.gmra.mxu2 %v126_v11  ;;  %215 = vmatpush.msra.mxu3 %v65_v12  ;;  %v125_v20 = vld.sshfl [vmem:[#allocation1 + $0x8] sm:$0xff pattern:$0x73625140]  ;;  %v105_v22 = vld [vmem:[%s674_s1 + $0x2c0] sm:$0xff]  ;;  %v104_v25 = vld [vmem:[%s674_s1 + $0x2b8] sm:$0xff] }
  0x2d   :  { %225 = vmatpush.msrb.mxu0 %v91_v13  ;;  %245 = vmatpush.msrb.mxu1 %v107_v14  ;;  %v113_v23 = vld [vmem:[%s674_s1 + $0x300] sm:$0xff]  ;;  %v130_v26 = vld.sshfl [vmem:[#allocation1 + $0x30] sm:$0xff pattern:$0x73625140]  ;;  %v86_v29 = vld [vmem:[%s674_s1 + $0x228] sm:$0xff] }
  0x2e   :  { %274 = vmatpush.msrb.mxu2 %v114_v15  ;;  %156 = vmatmul.f32.vlgmr.msra.gmra.mxu0 %v124_v16  ;;  %v87_v27 = vld [vmem:[%s674_s1 + $0x230] sm:$0xff]  ;;  %v102_v30 = vld [vmem:[%s674_s1 + $0x2a8] sm:$0xff]  ;;  %v85_v31 = vld [vmem:[%s674_s1 + $0x220] sm:$0xff] }
  0x2f   :  { %226 = vmatpush.msrb.mxu0 %v90_v17  ;;  %246 = vmatpush.msrb.mxu1 %v106_v18  ;;  %v103_v28 = vld [vmem:[%s674_s1 + $0x2b0] sm:$0xff]  ;;  %v101_v32 = vld [vmem:[%s674_s1 + $0x2a0] sm:$0xff]  ;;  %v84_v33 = vld [vmem:[%s674_s1 + $0x218] sm:$0xff] }
  0x30   :  { %216 = vmatmul.f32.vlgmr.msra.gmra.mxu3 %v127_v19  ;;  %176 = vmatmul.f32.vlgmr.msra.gmra.mxu1 %v125_v20  ;;  %v100_v34 = vld [vmem:[%s674_s1 + $0x298] sm:$0xff]  ;;  %v83_v35 = vld [vmem:[%s674_s1 + $0x210] sm:$0xff]  ;;  %v82_v37 = vld [vmem:[%s674_s1 + $0x208] sm:$0xff] }
  0x31   :  { %227 = vmatpush.msrb.mxu0 %v89_v21  ;;  %247 = vmatpush.msrb.mxu1 %v105_v22  ;;  %v99_v36 = vld [vmem:[%s674_s1 + $0x290] sm:$0xff]  ;;  %v98_v38 = vld [vmem:[%s674_s1 + $0x288] sm:$0xff]  ;;  %v81_v39 = vld [vmem:[%s674_s1 + $0x200] sm:$0xff] }
  0x32   :  { %275 = vmatpush.msrb.mxu2 %v113_v23  ;;  %v97_v40 = vld [vmem:[%s674_s1 + $0x280] sm:$0xff]  ;;  %v129_v42 = vld.sshfl [vmem:[#allocation1 + $0x28] sm:$0xff pattern:$0x73625140]  ;;  %s343_s1 = smov [#allocation2]  }
  0x33   :  { %228 = vmatpush.msrb.mxu0 %v88_v24  ;;  %248 = vmatpush.msrb.mxu1 %v104_v25  ;;  %v128_v41 = vld.sshfl [vmem:[#allocation1 + $0x20] sm:$0xff pattern:$0x73625140] }
  0x34   :  { %310 = vmatmul.msk.f32.vlgmr.msrb.gmra.mxu2 %vm137_vm0, %v130_v26  ;;  %v312_v43 = vld [vmem:[%s675_s2] ss:$0 sm:$0xff]  ;;  %s299_s2 = sshll.u32 %s343_s1, 4  ;;  %s300_s2 = int_to_ptr.vmem [resolvable:$true] %s299_s2 }
  0x35   :  { %229 = vmatpush.msrb.mxu0 %v87_v27  ;;  %249 = vmatpush.msrb.mxu1 %v103_v28 }
  0x37   :  { %230 = vmatpush.msrb.mxu0 %v86_v29  ;;  %250 = vmatpush.msrb.mxu1 %v102_v30 }
  0x39   :  { %231 = vmatpush.msrb.mxu0 %v85_v31  ;;  %251 = vmatpush.msrb.mxu1 %v101_v32 }
  0x3b   :  { %232 = vmatpush.msrb.mxu0 %v84_v33  ;;  %252 = vmatpush.msrb.mxu1 %v100_v34 }
  0x3d   :  { %233 = vmatpush.msrb.mxu0 %v83_v35  ;;  %253 = vmatpush.msrb.mxu1 %v99_v36 }
  0x3f   :  { %234 = vmatpush.msrb.mxu0 %v82_v37  ;;  %254 = vmatpush.msrb.mxu1 %v98_v38 }
  0x41   :  { %235 = vmatpush.msrb.mxu0 %v81_v39  ;;  %255 = vmatpush.msrb.mxu1 %v97_v40 }
  0x42   :  { %236 = vmatmul.f32.vlgmr.msrb.gmra.mxu0 %v128_v41  ;;  %256 = vmatmul.f32.vlgmr.msrb.gmra.mxu1 %v129_v42 }
  0xab   :  { %v157_v44 = vpop.f32.mrf.mxu0 }
  0xac   :  { %v158_v45 = vadd.f32 %v312_v43, %v157_v44 }
  0xad   :  { %v177_v46 = vpop.f32.mrf.mxu1 }
  0xae   :  { %v178_v47 = vadd.f32 %v177_v46, %v158_v45 }
  0xaf   :  { %v197_v48 = vpop.f32.mrf.mxu2 }
  0xb0   :  { %v198_v49 = vadd.f32 %v197_v48, %v178_v47 }
  0xb3   :  { %v217_v50 = vpop.f32.mrf.mxu3 }
  0xb4   :  { %v218_v51 = vadd.f32 %v217_v50, %v198_v49 }
  0xb7   :  { %v277_v55 = vpop.f32.mrf.mxu2 }
  0xbf   :  { %v237_v52 = vpop.f32.mrf.mxu0  ;;  %v257_v53 = vpop.f32.mrf.mxu1 }
  0xc0   :  { %v238_v54 = vadd.f32 %v237_v52, %v218_v51 }
  0xc2   :  { %v258_v56 = vadd.f32 %v257_v53, %v238_v54 }
  0xc4   :  { %v278_v57 = vadd.f32 %v277_v55, %v258_v56 }
  0xc6   :  { %v281_v58 = vsel %vm280_vm1, %v278_v57, -inf }
  0xc7   :  { %282 = vmax.xlane.f32.xlu0 %v281_v58 }
 0x13a   :  { %v283_v59 = vpop.xlane.xlu0 %282 }
 0x13b   :  { %v284_v60 = vsub.f32 %v278_v57, %v283_v59 }
 0x13d   :  { %v285_v61 = vmul.f32 1.442695, %v284_v60 }
 0x13f   :  { %313 = vpow2.f32 %v285_v61 }
 0x145   :  { %v314_v62 = vpop.eup %313 }
 0x146   :  { %v287_v63 = vsel %vm280_vm1, %v314_v62, 0.0 }
 0x147   :  { %288 = vadd.xlane.f32.xlu0 %v287_v63 }
 0x1ba   :  { %v289_v0 = vpop.xlane.xlu0 %288 }
 0x1bb   :  { %315 = vlog2.f32 %v289_v0 }
 0x1c1   :  { %v316_v1 = vpop.eup %315 }
 0x1c2   :  { %v291_v2 = vmul.f32 0.6931472, %v316_v1 }
 0x1c4   :  { %v292_v3 = vsub.f32 %v284_v60, %v291_v2 }
 0x1c6   :  { %293 = vst.msk [vmem:[#allocation2] sm:$0x3] %vm280_vm1, %v292_v3 }
 0x1c7   :  { %304 = dma.vmem_to_hbm [thread:$0]  %s300_s2, 32, %s302_s24, [#allocation3]  }
 0x1c8   :  { %341 = dma.done.wait [#allocation3], 32  }
 0x1c9   :  { %342 = vsyncadd [#allocation3], 4294967264 }
 0x1ca   :  { %309 = vsyncpa [#allocation3], 1 }

</bundles_post_ra>
